<compile_context>
chip_gen: v7x
topology: tpu7x:2x2x1
jax: 0.10.0
libtpu: 0.0.40
codegen_flags: <defaults>
</compile_context>

<pallas_src>
import jax
import jax.numpy as jnp
from jax import lax
from jax.experimental import pallas as pl
from jax.experimental.pallas import tpu as pltpu

DIM = 256          # hidden dim in the module (fc1 -> 256, fc2 -> 512)
LANE = 128
MAX_TILE_B = 1024  # fits comfortably in scoped VMEM on v5e/v6e/v7x
NEG_BIG = -1e30    # finite "minus infinity" for padded logit columns


def _round_up(x, m):
    return (x + m - 1) // m * m


def _choose_tiling(B, tile_b=None):
    """Pick (tile_b, grid_b, num_chunks).

    tile_b: multiple of 16, <= MAX_TILE_B, >= 2 grid steps when B > 16 so
    v7x's two TensorCores both get work, and batch padding < one tile.
    num_chunks: in-kernel row sub-chunks (>=128 rows each) used to overlap the
    log_softmax epilogue of chunk j with the matmuls of chunk j+1.
    """
    if tile_b is None:
        min_tiles = 2 if B > 16 else 1
        num_tiles = max(min_tiles, pl.cdiv(B, MAX_TILE_B))
        tile_b = _round_up(pl.cdiv(B, num_tiles), 16)
    else:
        tile_b = _round_up(min(tile_b, _round_up(B, 16)), 16)
    grid_b = pl.cdiv(B, tile_b)
    num_chunks = 1
    for c in (4, 2):
        if tile_b % c == 0 and (tile_b // c) % 16 == 0 and (tile_b // c) >= 128:
            num_chunks = c
            break
    return tile_b, grid_b, num_chunks


def _vmem_limit_bytes(tile_b, in_features, out_pad, num_chunks, out_itemsize):
    """Scoped-VMEM limit sized from the actual buffers, with headroom."""
    chunk = tile_b // num_chunks
    x_buf = 2 * tile_b * in_features * 4                  # double-buffered x
    o_buf = 2 * tile_b * out_pad * out_itemsize           # double-buffered out
    w_buf = 2 * ((in_features * DIM + DIM * 2 * DIM + 2 * DIM * out_pad) * 2
                 + (DIM + 2 * DIM + out_pad) * 4)          # resident (dbl-buf) weights
    # live intermediates (h1/h2/logits f32 + bf16 casts + temporaries), assume
    # up to ~2 overlapping chunks under the unrolled loop
    inter = 2 * chunk * (DIM * 6 + 2 * DIM * 6 + out_pad * 12)
    est = x_buf + o_buf + w_buf + inter
    return int(min(max(2 * est, 32 * 1024 * 1024), 64 * 1024 * 1024))


def _make_kernel(num_chunks, chunk):
    """Fused fc1->relu->fc2->relu->fc3->log_softmax over one batch tile."""

    def kernel(x_ref, w1_ref, b1_ref, w2_ref, b2_ref, w3_ref, b3_ref, o_ref):
        def compute(x_rows):
            # grad_reverse: identity in the forward pass.
            xb = x_rows.astype(jnp.bfloat16)
            # fc1 -> relu   (bn1 folded into w2/b2 by the wrapper)
            h1 = jnp.dot(xb, w1_ref[...], preferred_element_type=jnp.float32)
            h1 = jnp.maximum(h1 + b1_ref[...], 0.0)
            # dropout(p=0.6) -> identity in eval mode.
            # fc2 -> relu   (bn2 folded into w3/b3)
            h2 = jnp.dot(h1.astype(jnp.bfloat16), w2_ref[...],
                         preferred_element_type=jnp.float32)
            h2 = jnp.maximum(h2 + b2_ref[...], 0.0)
            # dropout(p=0.6) -> identity in eval mode.
            # fc3 -> log_softmax over the (lane-padded) class axis.
            logits = jnp.dot(h2.astype(jnp.bfloat16), w3_ref[...],
                             preferred_element_type=jnp.float32) + b3_ref[...]
            m = jnp.max(logits, axis=-1, keepdims=True)
            z = logits - m
            lse = jnp.log(jnp.sum(jnp.exp(z), axis=-1, keepdims=True))
            return (z - lse).astype(o_ref.dtype)

        if num_chunks == 1:
            o_ref[...] = compute(x_ref[...])
        else:
            # Sub-chunk the tile so the exp/max/sum epilogue of chunk j can be
            # scheduled under the MXU pushes of chunk j+1 (unrolled loop).
            def body(c, carry):
                rows = pl.ds(pl.multiple_of(c * chunk, chunk), chunk)
                o_ref[rows, :] = compute(x_ref[rows, :])
                return carry

            lax.fori_loop(0, num_chunks, body, None, unroll=True)

    return kernel


def prepare_params(p, in_features, out_features):
    """Fold eval-mode BN into the following linear layer, pad only the fc3
    output to a lane-dense width, cast weights to bf16 (f32 algebra once)."""
    out_pad = _round_up(max(out_features, LANE), LANE)

    # bn1(relu(fc1(x))) @ w2 + b2  ==  relu(fc1(x)) @ (s1^T * w2) + (t1 @ w2 + b2)
    w2f = p["s1"].reshape(-1, 1) * p["w2"]
    b2f = p["b2"] + p["t1"] @ p["w2"]
    # bn2(relu(fc2(.))) @ w3 + b3  ==  relu(fc2(.)) @ (s2^T * w3) + (t2 @ w3 + b3)
    w3f = p["s2"].reshape(-1, 1) * p["w3"]
    b3f = p["b3"] + p["t2"] @ p["w3"]

    # Pad fc3 output columns with zero weights and a large-finite-negative bias
    # so log_softmax ignores them (exp underflows to exactly 0).
    w3p = jnp.zeros((2 * DIM, out_pad), jnp.float32).at[:, :out_features].set(w3f)
    b3p = jnp.full((1, out_pad), NEG_BIG, jnp.float32).at[:, :out_features].set(b3f)

    return dict(
        w1=p["w1"].astype(jnp.bfloat16), b1=p["b1"].astype(jnp.float32),
        w2=w2f.astype(jnp.bfloat16), b2=b2f.astype(jnp.float32),
        w3=w3p.astype(jnp.bfloat16), b3=b3p.astype(jnp.float32),
        in_features=in_features, out_features=out_features, out_pad=out_pad,
    )


def site_classifier_forward(x, prep, *, tile_b=None, out_dtype=jnp.bfloat16):
    """x: (B, in_features) f32. Returns (B, out_features) log-probs (bf16)."""
    B, in_features = x.shape
    assert in_features == prep["in_features"]
    out_pad = prep["out_pad"]

    tile_b, grid_b, num_chunks = _choose_tiling(B, tile_b)
    chunk = tile_b // num_chunks
    out_itemsize = jnp.dtype(out_dtype).itemsize

    def resident(shape):
        # Weights / biases: same block every grid step -> stays VMEM-resident.
        # NOTE: default Buffered(2) kept; pl.Buffered(1) would save ~450 KiB of
        # VMEM but only matters when tile_b is pushed much harder.
        return pl.BlockSpec(shape, lambda i: (0, 0))

    rows = grid_b * tile_b
    flops = 2 * rows * (in_features * DIM + DIM * 2 * DIM + 2 * DIM * out_pad)
    bytes_accessed = (
        B * in_features * 4
        + (prep["w1"].size + prep["w2"].size + prep["w3"].size) * 2
        + (prep["b1"].size + prep["b2"].size + prep["b3"].size) * 4
        + B * out_pad * out_itemsize
    )

    out = pl.pallas_call(
        _make_kernel(num_chunks, chunk),
        out_shape=jax.ShapeDtypeStruct((B, out_pad), out_dtype),
        grid=(grid_b,),
        in_specs=[
            pl.BlockSpec((tile_b, in_features), lambda i: (i, 0)),   # x tile (f32)
            resident((in_features, DIM)), resident((1, DIM)),        # fc1
            resident((DIM, 2 * DIM)), resident((1, 2 * DIM)),        # fc2 (+bn1 folded)
            resident((2 * DIM, out_pad)), resident((1, out_pad)),    # fc3 (+bn2 folded)
        ],
        out_specs=pl.BlockSpec((tile_b, out_pad), lambda i: (i, 0)),
        compiler_params=pltpu.CompilerParams(
            dimension_semantics=("parallel",),
            vmem_limit_bytes=_vmem_limit_bytes(tile_b, in_features, out_pad,
                                               num_chunks, out_itemsize)),
        cost_estimate=pl.CostEstimate(
            flops=flops,
            transcendentals=rows * (out_pad + 1),
            bytes_accessed=bytes_accessed),
    )(x, prep["w1"], prep["b1"], prep["w2"], prep["b2"],
      prep["w3"], prep["b3"])

    return out[:, :prep["out_features"]]


def init_params(key, in_features, out_features):
    """Deterministic synthetic parameters matching site_classifier's shapes.
    Weights are stored transposed as (fan_in, fan_out) so x @ W applies."""
    ks = jax.random.split(key, 14)
    eps = 1e-5

    def lin(kw, kb, fan_in, fan_out):
        w = jax.random.normal(kw, (fan_in, fan_out), jnp.float32) * 0.05
        b = jax.random.normal(kb, (1, fan_out), jnp.float32) * 0.05
        return w, b

    def bn(kg, kb, km, kv, dim):
        gamma = 1.0 + 0.1 * jax.random.normal(kg, (1, dim), jnp.float32)
        beta = 0.1 * jax.random.normal(kb, (1, dim), jnp.float32)
        running_mean = 0.1 * jax.random.normal(km, (1, dim), jnp.float32)
        running_var = 1.0 + 0.1 * jax.random.uniform(kv, (1, dim), jnp.float32)
        scale = gamma / jnp.sqrt(running_var + eps)
        shift = beta - running_mean * scale
        return scale, shift

    w1, b1 = lin(ks[0], ks[1], in_features, DIM)
    s1, t1 = bn(ks[2], ks[3], ks[4], ks[5], DIM)
    w2, b2 = lin(ks[6], ks[7], DIM, 2 * DIM)
    s2, t2 = bn(ks[8], ks[9], ks[10], ks[11], 2 * DIM)
    w3, b3 = lin(ks[12], ks[13], 2 * DIM, out_features)
    return dict(w1=w1, b1=b1, s1=s1, t1=t1,
                w2=w2, b2=b2, s2=s2, t2=t2,
                w3=w3, b3=b3)


def reference_forward_f32(x, p):
    """Pure-JAX f32 reference of the original module semantics (eval mode)."""
    h1 = jnp.maximum(x @ p["w1"] + p["b1"], 0.0) * p["s1"] + p["t1"]
    h2 = jnp.maximum(h1 @ p["w2"] + p["b2"], 0.0) * p["s2"] + p["t2"]
    logits = h2 @ p["w3"] + p["b3"]
    return jax.nn.log_softmax(logits, axis=-1)


def reference_forward_kernel_math(x, prep):
    """Pure-JAX reference mirroring the kernel's bf16/fold/pad math (f32 out)."""
    xb = x.astype(jnp.bfloat16).astype(jnp.float32)
    w1 = prep["w1"].astype(jnp.float32)
    w2 = prep["w2"].astype(jnp.float32)
    w3 = prep["w3"].astype(jnp.float32)
    h1 = jnp.maximum(xb @ w1 + prep["b1"], 0.0)
    h1 = h1.astype(jnp.bfloat16).astype(jnp.float32)
    h2 = jnp.maximum(h1 @ w2 + prep["b2"], 0.0)
    h2 = h2.astype(jnp.bfloat16).astype(jnp.float32)
    logits = h2 @ w3 + prep["b3"]
    return jax.nn.log_softmax(logits, axis=-1)[:, :prep["out_features"]]


def _check(out, x, params, prep):
    B = x.shape[0]
    assert out.shape == (B, prep["out_features"])
    outf = out.astype(jnp.float32)
    assert bool(jnp.all(jnp.isfinite(outf)))
    # Tight-ish check vs a reference mirroring the kernel's bf16/fold math
    # (kernel output is bf16, so allow bf16 quantization of the log-probs).
    ref_k = reference_forward_kernel_math(x, prep)
    assert jnp.allclose(outf, ref_k, atol=3e-2, rtol=3e-2), \
        "mismatch vs bf16-consistent reference"
    # Loose check vs the original f32 module semantics.
    ref_f32 = reference_forward_f32(x, params)
    assert jnp.allclose(outf, ref_f32, atol=0.12, rtol=0.1), \
        "mismatch vs f32 module reference"
    # log_softmax rows should sum to ~1 in probability space.
    assert jnp.allclose(jnp.sum(jnp.exp(outf), axis=-1), 1.0, atol=2e-2)


if __name__ == "__main__":
    key = jax.random.PRNGKey(0)
    k_x, k_x2, k_p = jax.random.split(key, 3)

    in_features = 64    # < 128: fed un-padded (block last dim == full dim)
    out_features = 8    # exercises output-lane padding (8 -> 128 lanes)
    params = init_params(k_p, in_features, out_features)
    prep = prepare_params(params, in_features, out_features)

    # Case 1: tiny batch (single 16-row tile; batch "padding" handled by the
    # partial-block machinery, no wrapper-side copy of x at all).
    x = jax.random.normal(k_x, (12, in_features), jnp.float32)
    out = jax.block_until_ready(site_classifier_forward(x, prep))
    _check(out, x, params, prep)

    # Case 2: multi-tile batch with a partial last block (>=2 grid steps, so a
    # v7x megacore would split the tiles across its two TensorCores).
    x2 = jax.random.normal(k_x2, (40, in_features), jnp.float32)
    out2 = jax.block_until_ready(site_classifier_forward(x2, prep))
    _check(out2, x2, params, prep)

    print("KERNEL_OK")
</pallas_src>

<mosaic_0001>
module attributes {stable_mosaic.version = 11 : i64} {
  func.func @kernel(%arg0: i32, %arg1: memref<16x64xf32, #tpu.memory_space<vmem>>, %arg2: memref<64x256xbf16, #tpu.memory_space<vmem>>, %arg3: memref<1x256xf32, #tpu.memory_space<vmem>>, %arg4: memref<256x512xbf16, #tpu.memory_space<vmem>>, %arg5: memref<1x512xf32, #tpu.memory_space<vmem>>, %arg6: memref<512x128xbf16, #tpu.memory_space<vmem>>, %arg7: memref<1x128xf32, #tpu.memory_space<vmem>>, %arg8: memref<16x128xbf16, #tpu.memory_space<vmem>>) attributes {dimension_semantics = [#tpu.dimension_semantics<parallel>], iteration_bounds = array<i64: 1>, scalar_prefetch = 0 : i64, scratch_operands = 0 : i64, tpu.core_type = #tpu.core_type<tc>, window_params = [{transform_indices = @transform_0, window_bounds = array<i64: 16, 64>}, {pipeline_mode = #tpu.pipeline_mode<synchronous>, transform_indices = @transform_1, window_bounds = array<i64: 64, 256>}, {pipeline_mode = #tpu.pipeline_mode<synchronous>, transform_indices = @transform_2, window_bounds = array<i64: 1, 256>}, {pipeline_mode = #tpu.pipeline_mode<synchronous>, transform_indices = @transform_3, window_bounds = array<i64: 256, 512>}, {pipeline_mode = #tpu.pipeline_mode<synchronous>, transform_indices = @transform_4, window_bounds = array<i64: 1, 512>}, {pipeline_mode = #tpu.pipeline_mode<synchronous>, transform_indices = @transform_5, window_bounds = array<i64: 512, 128>}, {pipeline_mode = #tpu.pipeline_mode<synchronous>, transform_indices = @transform_6, window_bounds = array<i64: 1, 128>}, {transform_indices = @transform_7, window_bounds = array<i64: 16, 128>}]} {
    %c0 = arith.constant 0 : index
    %c0_0 = arith.constant 0 : index
    %0 = vector.load %arg1[%c0, %c0_0] : memref<16x64xf32, #tpu.memory_space<vmem>>, vector<16x64xf32>
    %1 = arith.truncf %0 : vector<16x64xf32> to vector<16x64xbf16>
    %c0_1 = arith.constant 0 : index
    %c0_2 = arith.constant 0 : index
    %2 = vector.load %arg2[%c0_1, %c0_2] : memref<64x256xbf16, #tpu.memory_space<vmem>>, vector<64x256xbf16>
    %cst = arith.constant dense<0.000000e+00> : vector<16x256xf32>
    %3 = tpu.matmul %1, %2, %cst {dimension_numbers = #tpu.dot_dimension_numbers<[1], [0], [0], [1], [0, 0, 1, 1], [], []>} : vector<16x64xbf16>, vector<64x256xbf16>, vector<16x256xf32> -> vector<16x256xf32>
    %c0_3 = arith.constant 0 : index
    %c0_4 = arith.constant 0 : index
    %4 = vector.load %arg3[%c0_3, %c0_4] : memref<1x256xf32, #tpu.memory_space<vmem>>, vector<1x256xf32>
    %5 = vector.broadcast %4 : vector<1x256xf32> to vector<16x256xf32>
    %6 = arith.addf %3, %5 : vector<16x256xf32>
    %cst_5 = arith.constant 0.000000e+00 : f32
    %7 = vector.broadcast %cst_5 : f32 to vector<16x256xf32>
    %8 = arith.maximumf %6, %7 : vector<16x256xf32>
    %9 = arith.truncf %8 : vector<16x256xf32> to vector<16x256xbf16>
    %c0_6 = arith.constant 0 : index
    %c0_7 = arith.constant 0 : index
    %10 = vector.load %arg4[%c0_6, %c0_7] : memref<256x512xbf16, #tpu.memory_space<vmem>>, vector<256x512xbf16>
    %cst_8 = arith.constant dense<0.000000e+00> : vector<16x512xf32>
    %11 = tpu.matmul %9, %10, %cst_8 {dimension_numbers = #tpu.dot_dimension_numbers<[1], [0], [0], [1], [0, 0, 1, 1], [], []>} : vector<16x256xbf16>, vector<256x512xbf16>, vector<16x512xf32> -> vector<16x512xf32>
    %c0_9 = arith.constant 0 : index
    %c0_10 = arith.constant 0 : index
    %12 = vector.load %arg5[%c0_9, %c0_10] : memref<1x512xf32, #tpu.memory_space<vmem>>, vector<1x512xf32>
    %13 = vector.broadcast %12 : vector<1x512xf32> to vector<16x512xf32>
    %14 = arith.addf %11, %13 : vector<16x512xf32>
    %cst_11 = arith.constant 0.000000e+00 : f32
    %15 = vector.broadcast %cst_11 : f32 to vector<16x512xf32>
    %16 = arith.maximumf %14, %15 : vector<16x512xf32>
    %17 = arith.truncf %16 : vector<16x512xf32> to vector<16x512xbf16>
    %c0_12 = arith.constant 0 : index
    %c0_13 = arith.constant 0 : index
    %18 = vector.load %arg6[%c0_12, %c0_13] : memref<512x128xbf16, #tpu.memory_space<vmem>>, vector<512x128xbf16>
    %cst_14 = arith.constant dense<0.000000e+00> : vector<16x128xf32>
    %19 = tpu.matmul %17, %18, %cst_14 {dimension_numbers = #tpu.dot_dimension_numbers<[1], [0], [0], [1], [0, 0, 1, 1], [], []>} : vector<16x512xbf16>, vector<512x128xbf16>, vector<16x128xf32> -> vector<16x128xf32>
    %c0_15 = arith.constant 0 : index
    %c0_16 = arith.constant 0 : index
    %20 = vector.load %arg7[%c0_15, %c0_16] : memref<1x128xf32, #tpu.memory_space<vmem>>, vector<1x128xf32>
    %21 = vector.broadcast %20 : vector<1x128xf32> to vector<16x128xf32>
    %22 = arith.addf %19, %21 : vector<16x128xf32>
    %cst_17 = arith.constant dense<0xFF800000> : vector<16xf32>
    %23 = vector.multi_reduction <maximumf>, %22, %cst_17 [1] : vector<16x128xf32> to vector<16xf32>
    %24 = vector.shape_cast %23 : vector<16xf32> to vector<16x1xf32>
    %25 = vector.broadcast %24 : vector<16x1xf32> to vector<16x128xf32>
    %26 = arith.subf %22, %25 : vector<16x128xf32>
    %27 = math.exp %26 : vector<16x128xf32>
    %cst_18 = arith.constant dense<0.000000e+00> : vector<16xf32>
    %28 = vector.multi_reduction <add>, %27, %cst_18 [1] : vector<16x128xf32> to vector<16xf32>
    %29 = vector.shape_cast %28 : vector<16xf32> to vector<16x1xf32>
    %30 = math.log %29 : vector<16x1xf32>
    %31 = vector.broadcast %30 : vector<16x1xf32> to vector<16x128xf32>
    %32 = arith.subf %26, %31 : vector<16x128xf32>
    %33 = arith.truncf %32 : vector<16x128xf32> to vector<16x128xbf16>
    %c0_19 = arith.constant 0 : index
    %c0_20 = arith.constant 0 : index
    %34 = vector.load %arg8[%c0_19, %c0_20] : memref<16x128xbf16, #tpu.memory_space<vmem>>, vector<16x128xbf16>
    tpu.vector_store %arg8[%c0_19, %c0_20], %33 {strides = array<i32>} : memref<16x128xbf16, #tpu.memory_space<vmem>>, vector<16x128xbf16>,
    return
  }
  func.func @transform_0(%arg0: i32) -> (i32, i32) {
    %c0_i32 = arith.constant 0 : i32
    %c0_i32_0 = arith.constant 0 : i32
    return %arg0, %c0_i32 : i32, i32
  }
  func.func @transform_1(%arg0: i32) -> (i32, i32) {
    %c0_i32 = arith.constant 0 : i32
    %c0_i32_0 = arith.constant 0 : i32
    %c0_i32_1 = arith.constant 0 : i32
    return %c0_i32, %c0_i32_0 : i32, i32
  }
  func.func @transform_2(%arg0: i32) -> (i32, i32) {
    %c0_i32 = arith.constant 0 : i32
    %c0_i32_0 = arith.constant 0 : i32
    %c0_i32_1 = arith.constant 0 : i32
    return %c0_i32, %c0_i32_0 : i32, i32
  }
  func.func @transform_3(%arg0: i32) -> (i32, i32) {
    %c0_i32 = arith.constant 0 : i32
    %c0_i32_0 = arith.constant 0 : i32
    %c0_i32_1 = arith.constant 0 : i32
    return %c0_i32, %c0_i32_0 : i32, i32
  }
  func.func @transform_4(%arg0: i32) -> (i32, i32) {
    %c0_i32 = arith.constant 0 : i32
    %c0_i32_0 = arith.constant 0 : i32
    %c0_i32_1 = arith.constant 0 : i32
    return %c0_i32, %c0_i32_0 : i32, i32
  }
  func.func @transform_5(%arg0: i32) -> (i32, i32) {
    %c0_i32 = arith.constant 0 : i32
    %c0_i32_0 = arith.constant 0 : i32
    %c0_i32_1 = arith.constant 0 : i32
    return %c0_i32, %c0_i32_0 : i32, i32
  }
  func.func @transform_6(%arg0: i32) -> (i32, i32) {
    %c0_i32 = arith.constant 0 : i32
    %c0_i32_0 = arith.constant 0 : i32
    %c0_i32_1 = arith.constant 0 : i32
    return %c0_i32, %c0_i32_0 : i32, i32
  }
  func.func @transform_7(%arg0: i32) -> (i32, i32) {
    %c0_i32 = arith.constant 0 : i32
    %c0_i32_0 = arith.constant 0 : i32
    return %arg0, %c0_i32 : i32, i32
  }
}

</mosaic_0001>

<bundles_post_ra>
// kernel: tpu_custom_call.1
= control target key start
LH: loop header
LB: loop body
LE: loop exit
PB: predicated region body
PF: predicated region fallthrough
CT: control target
= control target key end

     0   :  { %12 = vsyncpa [#allocation3], 0  ;;  %s1682_s0 = inlined_call_operand.hbm [shape: f32[12,64], index: 0, kind: input, shape index: {}]   ;;  %s1683_s1 = inlined_call_operand.hbm [shape: bf16[64,256], index: 1, kind: input, shape index: {}]   ;;  %s1684_s2 = inlined_call_operand.vmem [shape: f32[1,256], index: 2, kind: input, shape index: {}]   ;;  %s1685_s3 = inlined_call_operand.hbm [shape: bf16[256,512], index: 3, kind: input, shape index: {}]   ;;  %s1686_s4 = inlined_call_operand.vmem [shape: f32[1,512], index: 4, kind: input, shape index: {}]   ;;  %s1687_s5 = inlined_call_operand.hbm [shape: bf16[512,128], index: 5, kind: input, shape index: {}]   ;;  %s1688_s6 = inlined_call_operand.vmem [shape: f32[1,128], index: 6, kind: input, shape index: {}]   ;;  %s1689_s7 = inlined_call_operand.hbm [shape: bf16[12,128], index: 7, kind: output, shape index: {}]  }
   0x1   :  { %13 = vsyncpa [#allocation6], 0 }
   0x2   :  { %14 = vsyncpa [#allocation9], 0 }
   0x3   :  { %15 = vsyncpa [#allocation4], 0  ;;  %s1534_s24 = smov [#allocation5]   ;;  %s1535_s26 = smov [#allocation2]  }
   0x4   :  { %s33_s25 = sshll.u32 %s1534_s24, 4  ;;  %s21_s27 = sshll.u32 %s1535_s26, 4  ;;  %s34_s25 = int_to_ptr.vmem [resolvable:$true] %s33_s25  ;;  %s1586_s27 = int_to_ptr.vmem [resolvable:$true] %s21_s27 }
   0x5   :  { %s1416_s30 = scalar_lea.hbm %s1683_s1, 1024 }
   0x6   :  { %p1417_p0 = scmp.ne.s32.totalorder %s1683_s1, %s1416_s30  ;;  %p1420_p1 = scmp.lt.u32.totalorder %s1416_s30, %s1683_s1 }
   0x8   :  { %p1422_p2 = pnand %p1420_p1, %p1417_p0 }
   0xa   :  { %1425 = shalt.err (!%p1422_p2)
}
   0xb   :  { %s1426_s12 = scalar_lea.vmem %s34_s25, 1024  ;;  %p1431_p4 = scmp.lt.s32.totalorder %s34_s25, %s34_s25 }
   0xc   :  { %p1427_p3 = scmp.ne.s32.totalorder %s34_s25, %s1426_s12  ;;  %p1432_p5 = scmp.lt.s32.totalorder %s1426_s12, %s1426_s12 }
   0xe   :  { %p1433_p6 = por %p1432_p5, %p1431_p4 }
  0x10   :  { %p1434_p7 = pnand %p1433_p6, %p1427_p3 }
  0x12   :  { %1437 = shalt.err (!%p1434_p7)
}
  0x13   :  { %s1536_s13 = smov 128   ;;  %s1537_s14 = smov 8  }
  0x14   :  { %39 = dma.hbm_to_vmem [thread:$0]  %s1683_s1, 1024, %s34_s25, [#allocation6], %s1536_s13, %s1536_s13, %s1537_s14  }
  0x15   :  { %s1438_s19 = scalar_lea.hbm %s1682_s0, 256 }
  0x16   :  { %p1439_p8 = scmp.ne.s32.totalorder %s1682_s0, %s1438_s19  ;;  %p1442_p9 = scmp.lt.u32.totalorder %s1438_s19, %s1682_s0 }
  0x18   :  { %p1444_p10 = pnand %p1442_p9, %p1439_p8 }
  0x1a   :  { %1447 = shalt.err (!%p1444_p10)
}
  0x1b   :  { %s1448_s24 = scalar_lea.vmem %s1586_s27, 256  ;;  %p1453_p12 = scmp.lt.s32.totalorder %s1586_s27, %s1586_s27 }
  0x1c   :  { %p1449_p11 = scmp.ne.s32.totalorder %s1586_s27, %s1448_s24  ;;  %p1454_p13 = scmp.lt.s32.totalorder %s1448_s24, %s1448_s24 }
  0x1e   :  { %p1455_p0 = por %p1454_p13, %p1453_p12 }
  0x20   :  { %p1456_p1 = pnand %p1455_p0, %p1449_p11 }
  0x22   :  { %1459 = shalt.err (!%p1456_p1)
}
  0x23   :  { %27 = dma.hbm_to_vmem [thread:$0]  %s1682_s0, 256, %s1586_s27, [#allocation3], %s1536_s13, %s1536_s13, %s1537_s14  }
  0x24   :  { %s1538_s26 = smov [#allocation7]   ;;  %s1460_s8 = scalar_lea.hbm %s1685_s3, 8192 }
  0x25   :  { %s47_s28 = sshll.u32 %s1538_s26, 4  ;;  %p1461_p2 = scmp.ne.s32.totalorder %s1685_s3, %s1460_s8  ;;  %s48_s28 = int_to_ptr.vmem [resolvable:$true] %s47_s28 }
  0x26   :  { %p1464_p3 = scmp.lt.u32.totalorder %s1460_s8, %s1685_s3 }
  0x28   :  { %p1466_p4 = pnand %p1464_p3, %p1461_p2 }
  0x2a   :  { %1469 = shalt.err (!%p1466_p4)
}
  0x2b   :  { %s1470_s15 = scalar_lea.vmem %s48_s28, 8192  ;;  %p1475_p6 = scmp.lt.s32.totalorder %s48_s28, %s48_s28 }
  0x2c   :  { %p1471_p5 = scmp.ne.s32.totalorder %s48_s28, %s1470_s15  ;;  %p1476_p7 = scmp.lt.s32.totalorder %s1470_s15, %s1470_s15 }
  0x2e   :  { %p1477_p8 = por %p1476_p7, %p1475_p6 }
  0x30   :  { %p1478_p9 = pnand %p1477_p8, %p1471_p5 }
  0x32   :  { %1481 = shalt.err (!%p1478_p9)
}
  0x33   :  { %s1539_s0 = smov 256   ;;  %s1540_s27 = smov 16  }
  0x34   :  { %53 = dma.hbm_to_vmem [thread:$0]  %s1685_s3, 8192, %s48_s28, [#allocation6], %s1539_s0, %s1539_s0, %s1540_s27  }
  0x35   :  { %s1541_s16 = smov [#allocation8]   ;;  %s1482_s20 = scalar_lea.hbm %s1687_s5, 4096 }
  0x36   :  { %s61_s17 = sshll.u32 %s1541_s16, 4  ;;  %p1483_p10 = scmp.ne.s32.totalorder %s1687_s5, %s1482_s20  ;;  %s62_s17 = int_to_ptr.vmem [resolvable:$true] %s61_s17 }
  0x37   :  { %p1486_p11 = scmp.lt.u32.totalorder %s1482_s20, %s1687_s5 }
  0x39   :  { %p1488_p12 = pnand %p1486_p11, %p1483_p10 }
  0x3b   :  { %1491 = shalt.err (!%p1488_p12)
}
  0x3c   :  { %s1492_s1 = scalar_lea.vmem %s62_s17, 4096  ;;  %p1497_p0 = scmp.lt.s32.totalorder %s62_s17, %s62_s17 }
  0x3d   :  { %p1493_p13 = scmp.ne.s32.totalorder %s62_s17, %s1492_s1  ;;  %p1498_p1 = scmp.lt.s32.totalorder %s1492_s1, %s1492_s1 }
  0x3f   :  { %p1499_p2 = por %p1498_p1, %p1497_p0 }
  0x41   :  { %p1500_p3 = pnand %p1499_p2, %p1493_p13 }
  0x43   :  { %1503 = shalt.err (!%p1500_p3)
}
  0x44   :  { %s1542_s3 = smov 64   ;;  %s1543_s25 = smov 4  }
  0x45   :  { %67 = dma.hbm_to_vmem [thread:$0]  %s1687_s5, 4096, %s62_s17, [#allocation9], %s1542_s3, %s1542_s3, %s1543_s25  }
  0x46   :  { %1526 = dma.done.wait [#allocation3], 256  }
  0x47   :  { %1527 = vsyncadd [#allocation3], 4294967040 }
  0x48   :  { %1528 = dma.done.wait [#allocation6], 9216  }
  0x49   :  { %1529 = vsyncadd [#allocation6], 4294958080 }
  0x4a   :  { %1530 = dma.done.wait [#allocation9], 4096  }
  0x4b   :  { %1531 = vsyncadd [#allocation9], 4294963200  ;;  %v1544_v0 = vmov 0   ;;  %v1268_v1 = vld [vmem:[#allocation5 + $0x4] ss:$8 sps:$4 sm:$0xff]   ;;  %v83_v11 = vld [vmem:[#allocation2] sm:$0xff] }
  0x4c   :  { %182 = vmatprep.mubr.bf16.mxu0 %v1544_v0  ;;  %v1270_v2 = vld [vmem:[#allocation5] ss:$8 sps:$4 sm:$0xff]   ;;  %150 = vmatprep.subr.bf16.mxu0 %v1268_v1  ;;  %v1271_v3 = vld [vmem:[#allocation5 + $0x14] ss:$8 sps:$4 sm:$0xff]   ;;  %v1273_v4 = vld [vmem:[#allocation5 + $0x10] ss:$8 sps:$4 sm:$0xff]  }
  0x4d   :  { %151 = vmatpush1.bf16.msra.mxu0 %v1270_v2  ;;  %v1274_v5 = vld [vmem:[#allocation5 + $0x24] ss:$8 sps:$4 sm:$0xff]   ;;  %v1276_v7 = vld [vmem:[#allocation5 + $0x20] ss:$8 sps:$4 sm:$0xff]   ;;  %v1277_v8 = vld [vmem:[#allocation5 + $0x34] ss:$8 sps:$4 sm:$0xff]  }
  0x4e   :  { %152 = vmatprep.subr.bf16.mxu0 %v1271_v3  ;;  %v1280_v6 = vld [vmem:[#allocation7 + $0x4] ss:$16 sps:$4 sm:$0xff]   ;;  %v1285_v9 = vld [vmem:[#allocation7] ss:$16 sps:$4 sm:$0xff]   ;;  %v84_v13 = vld [vmem:[#allocation2 + $0x8] sm:$0xff]  ;;  %vm146_vm0 = vcmask 523264  }
  0x4f   :  { %605 = vmatprep.subr.bf16.mxu1 %v1280_v6  ;;  %v1279_v10 = vld [vmem:[#allocation5 + $0x30] ss:$8 sps:$4 sm:$0xff]   ;;  %v1286_v12 = vld [vmem:[#allocation7 + $0x24] ss:$16 sps:$4 sm:$0xff]   ;;  %v1284_v14 = vld [vmem:[#allocation7 + $0xc] ss:$16 sps:$4 sm:$0xff]   ;;  %v85_v18 = vpack.c.bf16 %v84_v13, %v83_v11 }
  0x50   :  { %606 = vmatpush1.bf16.msra.mxu1 %v1285_v9  ;;  %v1291_v15 = vld [vmem:[#allocation7 + $0x20] ss:$16 sps:$4 sm:$0xff]   ;;  %v1292_v16 = vld [vmem:[#allocation7 + $0x44] ss:$16 sps:$4 sm:$0xff]   ;;  %v1282_v17 = vld [vmem:[#allocation7 + $0x8] ss:$16 sps:$4 sm:$0xff]  }
  0x51   :  { %153 = vmatpush1.bf16.msra.mxu0 %v1273_v4  ;;  %607 = vmatprep.subr.bf16.mxu1 %v1286_v12  ;;  %v1297_v19 = vld [vmem:[#allocation7 + $0x40] ss:$16 sps:$4 sm:$0xff]   ;;  %v1298_v20 = vld [vmem:[#allocation7 + $0x64] ss:$16 sps:$4 sm:$0xff]   ;;  %v1290_v21 = vld [vmem:[#allocation7 + $0x2c] ss:$16 sps:$4 sm:$0xff]  }
  0x52   :  { %154 = vmatprep.subr.bf16.mxu0 %v1274_v5  ;;  %v1288_v22 = vld [vmem:[#allocation7 + $0x28] ss:$16 sps:$4 sm:$0xff]   ;;  %v1303_v23 = vld [vmem:[#allocation7 + $0x60] ss:$16 sps:$4 sm:$0xff]   ;;  %v1304_v24 = vld [vmem:[#allocation7 + $0x84] ss:$16 sps:$4 sm:$0xff]  }
  0x53   :  { %v1296_v25 = vld [vmem:[#allocation7 + $0x4c] ss:$16 sps:$4 sm:$0xff]   ;;  %v1294_v26 = vld [vmem:[#allocation7 + $0x48] ss:$16 sps:$4 sm:$0xff]   ;;  %v1309_v27 = vld [vmem:[#allocation7 + $0x80] ss:$16 sps:$4 sm:$0xff]  }
  0x54   :  { %608 = vmatpush1.bf16.msra.mxu1 %v1291_v15  ;;  %v1310_v28 = vld [vmem:[#allocation7 + $0xa4] ss:$16 sps:$4 sm:$0xff]   ;;  %v1302_v29 = vld [vmem:[#allocation7 + $0x6c] ss:$16 sps:$4 sm:$0xff]   ;;  %v1300_v30 = vld [vmem:[#allocation7 + $0x68] ss:$16 sps:$4 sm:$0xff]  }
  0x55   :  { %155 = vmatpush1.bf16.msra.mxu0 %v1276_v7  ;;  %609 = vmatprep.subr.bf16.mxu1 %v1292_v16  ;;  %v1315_v31 = vld [vmem:[#allocation7 + $0xa0] ss:$16 sps:$4 sm:$0xff]   ;;  %v1316_v32 = vld [vmem:[#allocation7 + $0xc4] ss:$16 sps:$4 sm:$0xff]   ;;  %v1308_v33 = vld [vmem:[#allocation7 + $0x8c] ss:$16 sps:$4 sm:$0xff]  }
  0x56   :  { %156 = vmatprep.subr.bf16.mxu0 %v1277_v8  ;;  %v1306_v34 = vld [vmem:[#allocation7 + $0x88] ss:$16 sps:$4 sm:$0xff]   ;;  %v1321_v35 = vld [vmem:[#allocation7 + $0xc0] ss:$16 sps:$4 sm:$0xff]   ;;  %v1322_v36 = vld [vmem:[#allocation7 + $0xe4] ss:$16 sps:$4 sm:$0xff]  }
  0x57   :  { %v1314_v37 = vld [vmem:[#allocation7 + $0xac] ss:$16 sps:$4 sm:$0xff]   ;;  %v1312_v38 = vld [vmem:[#allocation7 + $0xa8] ss:$16 sps:$4 sm:$0xff]   ;;  %v1327_v39 = vld [vmem:[#allocation7 + $0xe0] ss:$16 sps:$4 sm:$0xff]  }
  0x58   :  { %610 = vmatpush1.bf16.msra.mxu1 %v1297_v19  ;;  %v1328_v40 = vld [vmem:[#allocation7 + $0x104] ss:$16 sps:$4 sm:$0xff]   ;;  %v1320_v41 = vld [vmem:[#allocation7 + $0xcc] ss:$16 sps:$4 sm:$0xff]   ;;  %v1318_v42 = vld [vmem:[#allocation7 + $0xc8] ss:$16 sps:$4 sm:$0xff]  }
  0x59   :  { %157 = vmatpush1.bf16.msra.mxu0 %v1279_v10  ;;  %611 = vmatprep.subr.bf16.mxu1 %v1298_v20  ;;  %v1333_v43 = vld [vmem:[#allocation7 + $0x100] ss:$16 sps:$4 sm:$0xff]   ;;  %v1334_v44 = vld [vmem:[#allocation7 + $0x124] ss:$16 sps:$4 sm:$0xff]   ;;  %v1326_v45 = vld [vmem:[#allocation7 + $0xec] ss:$16 sps:$4 sm:$0xff]  }
  0x5a   :  { %648 = vmatprep.subr.bf16.mxu0 %v1284_v14  ;;  %v1324_v46 = vld [vmem:[#allocation7 + $0xe8] ss:$16 sps:$4 sm:$0xff]   ;;  %v1332_v47 = vld [vmem:[#allocation7 + $0x10c] ss:$16 sps:$4 sm:$0xff]   ;;  %v1339_v48 = vld [vmem:[#allocation7 + $0x120] ss:$16 sps:$4 sm:$0xff]   ;;  %v96_v14 = vlaneseq }
  0x5b   :  { %v1340_v49 = vld [vmem:[#allocation7 + $0x144] ss:$16 sps:$4 sm:$0xff]   ;;  %v1345_v50 = vld [vmem:[#allocation7 + $0x140] ss:$16 sps:$4 sm:$0xff]   ;;  %v1330_v51 = vld [vmem:[#allocation7 + $0x108] ss:$16 sps:$4 sm:$0xff]  }
  0x5c   :  { %1105 = vmatmul.mubr.msk.bf16.vlgmr.msra.gmra.mrb[0].mxu0 %vm146_vm0, %v85_v18  ;;  %612 = vmatpush1.bf16.msra.mxu1 %v1303_v23  ;;  %v1346_v52 = vld [vmem:[#allocation7 + $0x164] ss:$16 sps:$4 sm:$0xff]   ;;  %v1338_v53 = vld [vmem:[#allocation7 + $0x12c] ss:$16 sps:$4 sm:$0xff]   ;;  %v1351_v54 = vld [vmem:[#allocation7 + $0x160] ss:$16 sps:$4 sm:$0xff]  }
  0x5d   :  { %649 = vmatpush1.bf16.msra.mxu0 %v1282_v17  ;;  %613 = vmatprep.subr.bf16.mxu1 %v1304_v24  ;;  %v1336_v55 = vld [vmem:[#allocation7 + $0x128] ss:$16 sps:$4 sm:$0xff]   ;;  %v1352_v56 = vld [vmem:[#allocation7 + $0x184] ss:$16 sps:$4 sm:$0xff]   ;;  %v1344_v57 = vld [vmem:[#allocation7 + $0x14c] ss:$16 sps:$4 sm:$0xff]  }
  0x5e   :  { %650 = vmatprep.subr.bf16.mxu0 %v1290_v21  ;;  %v1357_v58 = vld [vmem:[#allocation7 + $0x180] ss:$16 sps:$4 sm:$0xff]   ;;  %v1342_v59 = vld [vmem:[#allocation7 + $0x148] ss:$16 sps:$4 sm:$0xff]   ;;  %v1358_v60 = vld [vmem:[#allocation7 + $0x1a4] ss:$16 sps:$4 sm:$0xff]  }
  0x5f   :  { %v1350_v61 = vld [vmem:[#allocation7 + $0x16c] ss:$16 sps:$4 sm:$0xff]   ;;  %v1348_v62 = vld [vmem:[#allocation7 + $0x168] ss:$16 sps:$4 sm:$0xff]   ;;  %v1363_v3 = vld [vmem:[#allocation7 + $0x1a0] ss:$16 sps:$4 sm:$0xff]  }
  0x60   :  { %614 = vmatpush1.bf16.msra.mxu1 %v1309_v27  ;;  %v1356_v63 = vld [vmem:[#allocation7 + $0x18c] ss:$16 sps:$4 sm:$0xff]   ;;  %v1354_v0 = vld [vmem:[#allocation7 + $0x188] ss:$16 sps:$4 sm:$0xff]   ;;  %v1364_v4 = vld [vmem:[#allocation7 + $0x1c4] ss:$16 sps:$4 sm:$0xff]  }
  0x61   :  { %651 = vmatpush1.bf16.msra.mxu0 %v1288_v22  ;;  %615 = vmatprep.subr.bf16.mxu1 %v1310_v28  ;;  %v1362_v1 = vld [vmem:[#allocation7 + $0x1ac] ss:$16 sps:$4 sm:$0xff]   ;;  %v1360_v2 = vld [vmem:[#allocation7 + $0x1a8] ss:$16 sps:$4 sm:$0xff]   ;;  %v1369_v7 = vld [vmem:[#allocation7 + $0x1c0] ss:$16 sps:$4 sm:$0xff]  }
  0x62   :  { %652 = vmatprep.subr.bf16.mxu0 %v1296_v25  ;;  %v1368_v5 = vld [vmem:[#allocation7 + $0x1cc] ss:$16 sps:$4 sm:$0xff]   ;;  %v1366_v6 = vld [vmem:[#allocation7 + $0x1c8] ss:$16 sps:$4 sm:$0xff]   ;;  %v1370_v8 = vld [vmem:[#allocation7 + $0x1e4] ss:$16 sps:$4 sm:$0xff]  }
  0x63   :  { %v1374_v9 = vld [vmem:[#allocation7 + $0x1ec] ss:$16 sps:$4 sm:$0xff]   ;;  %v1372_v10 = vld [vmem:[#allocation7 + $0x1e8] ss:$16 sps:$4 sm:$0xff]   ;;  %v1375_v11 = vld [vmem:[#allocation7 + $0x1e0] ss:$16 sps:$4 sm:$0xff]  }
  0x64   :  { %616 = vmatpush1.bf16.msra.mxu1 %v1315_v31  ;;  %v1376_v12 = vld [vmem:[#allocation8 + $0x40] sm:$0xff]   ;;  %v1644_v15 = vshrl.u32 %v96_v14, 7  ;;  %v94_v17 = vld [vmem:[%s1684_s2] sm:$0x3] }
  0x65   :  { %653 = vmatpush1.bf16.msra.mxu0 %v1294_v26  ;;  %617 = vmatprep.subr.bf16.mxu1 %v1316_v32  ;;  %v1377_v13 = vld [vmem:[#allocation8 + $0xc0] sm:$0xff]  }
  0x66   :  { %654 = vmatprep.subr.bf16.mxu0 %v1302_v29  ;;  %v98_v16 = vsub.s32 0, %v1644_v15  ;;  %v102_v18 = vsub.s32 1, %v1644_v15 }
  0x68   :  { %618 = vmatpush1.bf16.msra.mxu1 %v1321_v35  ;;  %v99_v19 = vrot.slane %v94_v17, %v98_v16  ;;  %v103_v20 = vrot.slane %v94_v17, %v102_v18  ;;  %v1378_v35 = vld [vmem:[#allocation8] sm:$0xff]  }
  0x69   :  { %655 = vmatpush1.bf16.msra.mxu0 %v1300_v30  ;;  %619 = vmatprep.subr.bf16.mxu1 %v1322_v36  ;;  %v1379_v36 = vld [vmem:[#allocation8 + $0x80] sm:$0xff]  }
  0x6a   :  { %656 = vmatprep.subr.bf16.mxu0 %v1308_v33 }
  0x6c   :  { %620 = vmatpush1.bf16.msra.mxu1 %v1327_v39  ;;  %v1382_v39 = vld [vmem:[#allocation8 + $0x8] sm:$0xff]  }
  0x6d   :  { %657 = vmatpush1.bf16.msra.mxu0 %v1306_v34  ;;  %621 = vmatprep.subr.bf16.mxu1 %v1328_v40  ;;  %v1383_v40 = vld [vmem:[#allocation8 + $0x88] sm:$0xff]  }
  0x6e   :  { %658 = vmatprep.subr.bf16.mxu0 %v1314_v37  ;;  %v1380_v37 = vld [vmem:[#allocation8 + $0x48] sm:$0xff]  }
  0x70   :  { %622 = vmatpush1.bf16.msra.mxu1 %v1333_v43  ;;  %v1386_v43 = vld [vmem:[#allocation8 + $0x10] sm:$0xff]  }
  0x71   :  { %659 = vmatpush1.bf16.msra.mxu0 %v1312_v38  ;;  %623 = vmatprep.subr.bf16.mxu1 %v1334_v44  ;;  %v1381_v38 = vld [vmem:[#allocation8 + $0xc8] sm:$0xff]   ;;  %v1387_v44 = vld [vmem:[#allocation8 + $0x90] sm:$0xff]  }
  0x72   :  { %660 = vmatprep.subr.bf16.mxu0 %v1320_v41  ;;  %v1384_v41 = vld [vmem:[#allocation8 + $0x50] sm:$0xff]  }
  0x74   :  { %624 = vmatpush1.bf16.msra.mxu1 %v1339_v48  ;;  %v1391_v48 = vld [vmem:[#allocation8 + $0x98] sm:$0xff]  }
  0x75   :  { %661 = vmatpush1.bf16.msra.mxu0 %v1318_v42  ;;  %625 = vmatprep.subr.bf16.mxu1 %v1340_v49  ;;  %v1385_v42 = vld [vmem:[#allocation8 + $0xd0] sm:$0xff]   ;;  %v1392_v49 = vld [vmem:[#allocation8 + $0x60] sm:$0xff]  }
  0x76   :  { %662 = vmatprep.subr.bf16.mxu0 %v1326_v45  ;;  %v1388_v45 = vld [vmem:[#allocation8 + $0x58] sm:$0xff]  }
  0x78   :  { %626 = vmatpush1.bf16.msra.mxu1 %v1345_v50  ;;  %v1393_v50 = vld [vmem:[#allocation8 + $0xe0] sm:$0xff]  }
  0x79   :  { %663 = vmatpush1.bf16.msra.mxu0 %v1324_v46  ;;  %627 = vmatprep.subr.bf16.mxu1 %v1346_v52  ;;  %v1389_v46 = vld [vmem:[#allocation8 + $0xd8] sm:$0xff]   ;;  %v1395_v52 = vld [vmem:[#allocation8 + $0xa0] sm:$0xff]  }
  0x7a   :  { %664 = vmatprep.subr.bf16.mxu0 %v1332_v47  ;;  %v1390_v47 = vld [vmem:[#allocation8 + $0x18] sm:$0xff]  }
  0x7c   :  { %628 = vmatpush1.bf16.msra.mxu1 %v1351_v54  ;;  %v1397_v54 = vld [vmem:[#allocation8 + $0xe8] sm:$0xff]  }
  0x7d   :  { %665 = vmatpush1.bf16.msra.mxu0 %v1330_v51  ;;  %629 = vmatprep.subr.bf16.mxu1 %v1352_v56  ;;  %v1394_v51 = vld [vmem:[#allocation8 + $0x20] sm:$0xff]   ;;  %v1399_v56 = vld [vmem:[#allocation8 + $0xa8] sm:$0xff]  }
  0x7e   :  { %666 = vmatprep.subr.bf16.mxu0 %v1338_v53  ;;  %v1396_v53 = vld [vmem:[#allocation8 + $0x68] sm:$0xff]  }
  0x80   :  { %630 = vmatpush1.bf16.msra.mxu1 %v1357_v58  ;;  %v1401_v58 = vld [vmem:[#allocation8 + $0xf0] sm:$0xff]  }
  0x81   :  { %667 = vmatpush1.bf16.msra.mxu0 %v1336_v55  ;;  %631 = vmatprep.subr.bf16.mxu1 %v1358_v60  ;;  %v1398_v55 = vld [vmem:[#allocation8 + $0x28] sm:$0xff]   ;;  %v1403_v60 = vld [vmem:[#allocation8 + $0xb0] sm:$0xff]  }
  0x82   :  { %668 = vmatprep.subr.bf16.mxu0 %v1344_v57  ;;  %v1400_v57 = vld [vmem:[#allocation8 + $0x70] sm:$0xff]  }
  0x84   :  { %632 = vmatpush1.bf16.msra.mxu1 %v1363_v3  ;;  %v279_v3 = vsub.s32 3, %v1644_v15 }
  0x85   :  { %669 = vmatpush1.bf16.msra.mxu0 %v1342_v59  ;;  %633 = vmatprep.subr.bf16.mxu1 %v1364_v4  ;;  %v1402_v59 = vld [vmem:[#allocation8 + $0x30] sm:$0xff]  }
  0x86   :  { %670 = vmatprep.subr.bf16.mxu0 %v1350_v61  ;;  %v1404_v61 = vld [vmem:[#allocation8 + $0x78] sm:$0xff]  }
  0x88   :  { %634 = vmatpush1.bf16.msra.mxu1 %v1369_v7 }
  0x89   :  { %671 = vmatpush1.bf16.msra.mxu0 %v1348_v62  ;;  %635 = vmatprep.subr.bf16.mxu1 %v1370_v8  ;;  %v1405_v62 = vld [vmem:[#allocation8 + $0xf8] sm:$0xff]  }
  0x8a   :  { %672 = vmatprep.subr.bf16.mxu0 %v1356_v63  ;;  %v1406_v63 = vld [vmem:[#allocation8 + $0x38] sm:$0xff]  }
  0x8c   :  { %636 = vmatpush1.bf16.msra.mxu1 %v1375_v11 }
  0x8d   :  { %673 = vmatpush1.bf16.msra.mxu0 %v1354_v0  ;;  %1212 = vmatprep.subr.bf16.mxu1 %v1376_v12  ;;  %v1407_v0 = vld [vmem:[#allocation8 + $0xb8] sm:$0xff]  }
  0x8e   :  { %674 = vmatprep.subr.bf16.mxu0 %v1362_v1  ;;  %v275_v1 = vsub.s32 2, %v1644_v15 }
  0x91   :  { %675 = vmatpush1.bf16.msra.mxu0 %v1360_v2  ;;  %v263_v2 = vld [vmem:[%s1686_s4] sm:$0xf] }
  0x92   :  { %676 = vmatprep.subr.bf16.mxu0 %v1368_v5  ;;  %v268_v4 = vrot.slane %v263_v2, %v98_v16  ;;  %v276_v5 = vrot.slane %v263_v2, %v275_v1  ;;  %v280_v7 = vrot.slane %v263_v2, %v279_v3 }
  0x95   :  { %677 = vmatpush1.bf16.msra.mxu0 %v1366_v6  ;;  %v272_v6 = vrot.slane %v263_v2, %v102_v18 }
  0x96   :  { %678 = vmatprep.subr.bf16.mxu0 %v1374_v9 }
  0x99   :  { %679 = vmatpush1.bf16.msra.mxu0 %v1372_v10 }
  0x9a   :  { %1234 = vmatprep.subr.bf16.mxu0 %v1377_v13 }
 0x12f   :  { %v184_v21 = vpop.f32.mrb[0].mxu0 }
 0x130   :  { %v185_v22 = vadd.f32 %v184_v21, %v99_v19  ;;  %v186_v23 = vpop.f32.mrb[1].mxu0 }
 0x131   :  { %v187_v24 = vadd.f32 %v186_v23, %v103_v20  ;;  %v188_v25 = vpop.f32.mrb[2].mxu0 }
 0x132   :  { %v189_v26 = vadd.f32 %v188_v25, %v99_v19  ;;  %v190_v27 = vpop.f32.mrb[3].mxu0  ;;  %v193_v29 = vmax.f32 %v185_v22, 0.0 }
 0x133   :  { %v191_v28 = vadd.f32 %v190_v27, %v103_v20  ;;  %v194_v31 = vmax.f32 %v187_v24, 0.0 }
 0x134   :  { %v195_v30 = vmax.f32 %v189_v26, 0.0 }
 0x135   :  { %v196_v32 = vmax.f32 %v191_v28, 0.0 }
 0x136   :  { %v197_v33 = vpack.c.bf16 %v195_v30, %v193_v29 }
 0x137   :  { %v198_v34 = vpack.c.bf16 %v196_v32, %v194_v31 }
 0x139   :  { %637 = vmatprep.mubr.bf16.mxu1 %v198_v34  ;;  %680 = vmatprep.mubr.bf16.mxu0 %v198_v34 }
 0x13a   :  { %638 = vmatmul.mubr.bf16.vlgmr.msra.gmra.mrb[0].mxu1 %v197_v33  ;;  %681 = vmatmul.mubr.bf16.vlgmr.msra.gmra.mrb[4].mxu0 %v197_v33 }
 0x13b   :  { %1213 = vmatpush3.bf16.msra.mxu1 %v1378_v35  ;;  %1235 = vmatpush3.bf16.msra.mxu0 %v1379_v36 }
 0x13c   :  { %1214 = vmatprep.subr.bf16.mxu1 %v1380_v37  ;;  %1236 = vmatprep.subr.bf16.mxu0 %v1381_v38  ;;  %v1170_v38 = vld [vmem:[%s1688_s6] ss:$0 sm:$0xff]  ;;  %s1545_s6 = smov [#allocation10]  }
 0x13d   :  { %s1083_s9 = sshll.u32 %s1545_s6, 4  ;;  %s1084_s9 = int_to_ptr.vmem [resolvable:$true] %s1083_s9 }
 0x13e   :  { %s1504_s10 = scalar_lea.vmem %s1084_s9, 128  ;;  %p1509_p5 = scmp.lt.s32.totalorder %s1084_s9, %s1084_s9 }
 0x13f   :  { %1215 = vmatpush3.bf16.msra.mxu1 %v1382_v39  ;;  %1237 = vmatpush3.bf16.msra.mxu0 %v1383_v40  ;;  %p1505_p4 = scmp.ne.s32.totalorder %s1084_s9, %s1504_s10  ;;  %p1510_p6 = scmp.lt.s32.totalorder %s1504_s10, %s1504_s10 }
 0x140   :  { %1216 = vmatprep.subr.bf16.mxu1 %v1384_v41  ;;  %1238 = vmatprep.subr.bf16.mxu0 %v1385_v42 }
 0x141   :  { %p1511_p7 = por %p1510_p6, %p1509_p5 }
 0x143   :  { %1217 = vmatpush3.bf16.msra.mxu1 %v1386_v43  ;;  %1239 = vmatpush3.bf16.msra.mxu0 %v1387_v44  ;;  %p1512_p8 = pnand %p1511_p7, %p1505_p4 }
 0x144   :  { %1218 = vmatprep.subr.bf16.mxu1 %v1388_v45  ;;  %1240 = vmatprep.subr.bf16.mxu0 %v1389_v46 }
 0x147   :  { %1219 = vmatpush3.bf16.msra.mxu1 %v1390_v47  ;;  %1241 = vmatpush3.bf16.msra.mxu0 %v1391_v48 }
 0x148   :  { %1220 = vmatprep.subr.bf16.mxu1 %v1392_v49  ;;  %1242 = vmatprep.subr.bf16.mxu0 %v1393_v50 }
 0x14b   :  { %1221 = vmatpush3.bf16.msra.mxu1 %v1394_v51  ;;  %1243 = vmatpush3.bf16.msra.mxu0 %v1395_v52 }
 0x14c   :  { %1222 = vmatprep.subr.bf16.mxu1 %v1396_v53  ;;  %1244 = vmatprep.subr.bf16.mxu0 %v1397_v54 }
 0x14f   :  { %1223 = vmatpush3.bf16.msra.mxu1 %v1398_v55  ;;  %1245 = vmatpush3.bf16.msra.mxu0 %v1399_v56 }
 0x150   :  { %1224 = vmatprep.subr.bf16.mxu1 %v1400_v57  ;;  %1246 = vmatprep.subr.bf16.mxu0 %v1401_v58 }
 0x153   :  { %1225 = vmatpush3.bf16.msra.mxu1 %v1402_v59  ;;  %1247 = vmatpush3.bf16.msra.mxu0 %v1403_v60 }
 0x154   :  { %1226 = vmatprep.subr.bf16.mxu1 %v1404_v61  ;;  %1248 = vmatprep.subr.bf16.mxu0 %v1405_v62 }
 0x157   :  { %1227 = vmatpush3.bf16.msra.mxu1 %v1406_v63  ;;  %1249 = vmatpush3.bf16.msra.mxu0 %v1407_v0 }
 0x20d   :  { %v639_v8 = vpop.f32.mrb[0].mxu1  ;;  %v682_v9 = vpop.f32.mrb[4].mxu0 }
 0x20e   :  { %v640_v10 = vadd.f32 %v639_v8, %v268_v4  ;;  %v683_v11 = vadd.f32 %v682_v9, %v276_v5  ;;  %v641_v12 = vpop.f32.mrb[1].mxu1  ;;  %v684_v13 = vpop.f32.mrb[5].mxu0 }
 0x20f   :  { %v642_v14 = vadd.f32 %v641_v12, %v272_v6  ;;  %v685_v17 = vadd.f32 %v684_v13, %v280_v7  ;;  %v643_v19 = vpop.f32.mrb[2].mxu1  ;;  %v686_v20 = vpop.f32.mrb[6].mxu0 }
 0x210   :  { %v644_v21 = vadd.f32 %v643_v19, %v268_v4  ;;  %v687_v22 = vadd.f32 %v686_v20, %v276_v5  ;;  %v645_v23 = vpop.f32.mrb[3].mxu1  ;;  %v688_v24 = vpop.f32.mrb[7].mxu0  ;;  %v691_v26 = vmax.f32 %v640_v10, 0.0  ;;  %v693_v15 = vmax.f32 %v683_v11, 0.0 }
 0x211   :  { %v646_v16 = vadd.f32 %v645_v23, %v272_v6  ;;  %v689_v25 = vadd.f32 %v688_v24, %v280_v7  ;;  %v692_v28 = vmax.f32 %v642_v14, 0.0  ;;  %v694_v29 = vmax.f32 %v685_v17, 0.0 }
 0x212   :  { %v695_v18 = vmax.f32 %v644_v21, 0.0  ;;  %v697_v27 = vmax.f32 %v687_v22, 0.0 }
 0x213   :  { %v696_v30 = vmax.f32 %v646_v16, 0.0  ;;  %v698_v31 = vmax.f32 %v689_v25, 0.0 }
 0x214   :  { %v699_v32 = vpack.c.bf16 %v695_v18, %v691_v26  ;;  %v701_v33 = vpack.c.bf16 %v697_v27, %v693_v15 }
 0x215   :  { %v700_v34 = vpack.c.bf16 %v696_v30, %v692_v28  ;;  %v702_v35 = vpack.c.bf16 %v698_v31, %v694_v29 }
 0x217   :  { %998 = vmatprep.mubr.bf16.mxu1 %v700_v34  ;;  %1039 = vmatprep.mubr.bf16.mxu0 %v702_v35 }
 0x218   :  { %999 = vmatmul.mubr.bf16.vlgmr.msra.gmra.mrb[4].mxu1 %v699_v32  ;;  %1040 = vmatmul.mubr.bf16.vlgmr.msra.gmra.mrb[8].mxu0 %v701_v33 }
 0x2eb   :  { %v1228_v36 = vpop.f32.mrb[4].mxu1  ;;  %v1250_v37 = vpop.f32.mrb[8].mxu0 }
 0x2ec   :  { %v1229_v39 = vpop.f32.mrb[5].mxu1  ;;  %v1251_v40 = vpop.f32.mrb[9].mxu0 }
 0x2ed   :  { %v1230_v41 = vadd.f32 %v1229_v39, %v1228_v36  ;;  %v1252_v42 = vadd.f32 %v1251_v40, %v1250_v37  ;;  %v1231_v43 = vpop.f32.mrb[6].mxu1  ;;  %v1253_v44 = vpop.f32.mrb[10].mxu0 }
 0x2ee   :  { %v1232_v45 = vpop.f32.mrb[7].mxu1  ;;  %v1254_v46 = vpop.f32.mrb[11].mxu0 }
 0x2ef   :  { %v1001_v47 = vadd.f32 %v1230_v41, %v1170_v38  ;;  %v1233_v48 = vadd.f32 %v1232_v45, %v1231_v43  ;;  %v1255_v49 = vadd.f32 %v1254_v46, %v1253_v44 }
 0x2f1   :  { %v1004_v50 = vadd.f32 %v1233_v48, %v1170_v38  ;;  %v1042_v51 = vadd.f32 %v1252_v42, %v1001_v47 }
 0x2f3   :  { %1048 = vmax.xlane.f32.xlu0 %v1042_v51  ;;  %v1045_v52 = vadd.f32 %v1255_v49, %v1004_v50 }
 0x2f7   :  { %1050 = vmax.xlane.f32.xlu0 %v1045_v52 }
 0x380   :  { %v1049_v53 = vpop.xlane.xlu0 %1048 }
 0x381   :  { %v1052_v54 = vsub.f32 %v1042_v51, %v1049_v53 }
 0x383   :  { %v1054_v55 = vmul.f32 1.442695, %v1052_v54 }
 0x384   :  { %v1051_v56 = vpop.xlane.xlu0 %1050 }
 0x385   :  { %v1053_v57 = vsub.f32 %v1045_v52, %v1051_v56  ;;  %1408 = vpow2.f32 %v1054_v55 }
 0x387   :  { %v1056_v58 = vmul.f32 1.442695, %v1053_v57 }
 0x389   :  { %1410 = vpow2.f32 %v1056_v58 }
 0x38f   :  { %v1409_v59 = vpop.eup %1408 }
 0x390   :  { %1058 = vadd.xlane.f32.xlu1 %v1409_v59 }
 0x393   :  { %v1411_v60 = vpop.eup %1410 }
 0x394   :  { %1060 = vadd.xlane.f32.xlu1 %v1411_v60 }
 0x41d   :  { %v1059_v61 = vpop.xlane.xlu1 %1058 }
 0x41e   :  { %1412 = vlog2.f32 %v1059_v61 }
 0x421   :  { %v1061_v62 = vpop.xlane.xlu1 %1060 }
 0x422   :  { %1414 = vlog2.f32 %v1061_v62 }
 0x428   :  { %v1413_v63 = vpop.eup %1412 }
 0x429   :  { %v1063_v0 = vmul.f32 0.6931472, %v1413_v63 }
 0x42b   :  { %v1066_v3 = vsub.f32 %v1052_v54, %v1063_v0 }
 0x42c   :  { %v1415_v1 = vpop.eup %1414 }
 0x42d   :  { %v1065_v2 = vmul.f32 0.6931472, %v1415_v1 }
 0x42f   :  { %v1067_v4 = vsub.f32 %v1053_v57, %v1065_v2 }
 0x431   :  { %v1210_v5 = vpack.c.bf16 %v1067_v4, %v1066_v3 }
 0x433   :  { %1211 = vst [vmem:[#allocation10] sm:$0xff] %v1210_v5  }
 0x434   :  { %1515 = shalt.err (!%p1512_p8)
}
 0x435   :  { %s1516_s15 = scalar_lea.hbm %s1689_s7, 128 }
 0x436   :  { %p1517_p9 = scmp.ne.s32.totalorder %s1689_s7, %s1516_s15  ;;  %p1520_p10 = scmp.lt.u32.totalorder %s1516_s15, %s1689_s7 }
 0x438   :  { %p1522_p11 = pnand %p1520_p10, %p1517_p9 }
 0x43a   :  { %1525 = shalt.err (!%p1522_p11)
}
 0x43b   :  { %1089 = dma.vmem_to_hbm [thread:$0]  %s1084_s9, 128, %s1689_s7, [#allocation4], %s1542_s3, %s1542_s3, %s1543_s25  }
 0x43c   :  { %1532 = dma.done.wait [#allocation4], 128  }
 0x43d   :  { %1533 = vsyncadd [#allocation4], 4294967168 }
 0x43e   :  { %1093 = vsyncpa [#allocation3], 1 }
 0x43f   :  { %1094 = vsyncpa [#allocation6], 1 }
 0x440   :  { %1095 = vsyncpa [#allocation9], 1 }
 0x441   :  { %1096 = vsyncpa [#allocation4], 1 }

</bundles_post_ra>
